<compile_context>
chip_gen: v7x
topology: tpu7x:2x2x1
jax: 0.10.0
libtpu: 0.0.40
codegen_flags: <defaults>
</compile_context>

<pallas_src>
import jax
import jax.numpy as jnp
from jax.experimental import pallas as pl
from jax.experimental.pallas import tpu as pltpu

_LANE = 128        # vreg lane width
_BATCH_ALIGN = 16  # bf16 sublane packing (16 rows / vreg); also satisfies the f32 multiple-of-8


def _round_up(n, m):
    return ((n + m - 1) // m) * m


def _pad2d(a, rows, cols):
    pr, pc = rows - a.shape[0], cols - a.shape[1]
    if pr == 0 and pc == 0:
        return a
    return jnp.pad(a, ((0, pr), (0, pc)))


def _make_fused_mlp_kernel(n_hidden, emb_width, compute_dtype):
    """Kernel args: (x_ref, w0, b0, ..., w_{n-1}, b_{n-1}, wf, bf, o_ref[, emb_ref])."""
    want_emb = emb_width is not None

    def kernel(x_ref, *refs):
        if want_emb:
            wb, o_ref, emb_ref = refs[:-2], refs[-2], refs[-1]
        else:
            wb, o_ref = refs[:-1], refs[-1]
            emb_ref = None

        h = x_ref[...]                     # (TB, F_in) bf16 input tile
        emb_f32 = None

        # Hidden Linear + ReLU layers, chained entirely in vregs / VMEM.
        for li in range(n_hidden):
            w = wb[2 * li][...]
            b = wb[2 * li + 1][...]
            y = jnp.dot(h, w, preferred_element_type=jnp.float32) + b   # f32 acc + bias
            y = jnp.maximum(y, 0.0)                                     # f32 VPU ReLU
            emb_f32 = y
            h = y.astype(compute_dtype)

        # Final layer straight to the true logits width (no padded 128-wide writeback).
        wf = wb[2 * n_hidden][...]
        bf = wb[2 * n_hidden + 1][...]
        logits = jnp.dot(h, wf, preferred_element_type=jnp.float32) + bf
        o_ref[...] = logits.astype(o_ref.dtype)

        if want_emb:
            emb_ref[...] = emb_f32[:, :emb_width].astype(emb_ref.dtype)

    return kernel


def linear_nn_forward(params, tabular_data, sequence_data=None, return_embeddings=False,
                      *, compute_dtype=jnp.bfloat16, block_batch=1024):
    """Matches LinearNNModel.forward: hidden Linear+ReLU stack, final Linear -> 2 logits."""
    del sequence_data  # unused by the PyTorch forward as well

    hidden = params["linear_layers"]
    wf, bf = params["final_layer"]
    n_hidden = len(hidden)

    B, F_in = tabular_data.shape
    n_logits = wf.shape[1]

    # Feature widths: input and logits stay at their true widths (HBM traffic);
    # internal hidden dims are lane-padded to 128 (lane-dense MXU/VPU, exact zero padding).
    hidden_dims = [w.shape[1] for (w, _) in hidden]
    hp = [F_in] + [_round_up(max(d, 1), _LANE) for d in hidden_dims] + [n_logits]

    # Batch tiling: big tile (amortizes ~0.35 us/step overhead), rounded to 16 for bf16
    # sublane packing, and at least 2 grid steps whenever the batch allows (v7x has 2 TCs).
    B16 = _round_up(B, _BATCH_ALIGN)
    TB = _round_up(min(block_batch, B16), _BATCH_ALIGN)
    if B16 >= 2 * _BATCH_ALIGN and B16 // TB < 2:
        TB = _round_up((B16 + 1) // 2, _BATCH_ALIGN)
    Bp = _round_up(B, TB)
    grid = (Bp // TB,)

    # ---- inputs (x unpadded in the feature dim; weights padded only on hidden dims) ----
    x_p = _pad2d(tabular_data.astype(compute_dtype), Bp, F_in)
    flat_inputs = [x_p]

    layer_wb = list(hidden) + [(wf, bf)]
    for li, (w, b) in enumerate(layer_wb):
        wp = _pad2d(w.astype(compute_dtype), hp[li], hp[li + 1])
        bp = _pad2d(b.reshape(1, -1).astype(jnp.float32), 1, hp[li + 1])
        flat_inputs += [wp, bp]

    def make_in_specs(single_buffer_weights):
        specs = [pl.BlockSpec((TB, F_in), lambda i: (i, 0))]       # x: pipelined along batch
        extra = {}
        if single_buffer_weights:
            # Constant index_map => never re-fetched; single-buffer to halve VMEM footprint.
            extra = dict(pipeline_mode=pl.Buffered(1))
        for li in range(len(layer_wb)):
            kd, nd = hp[li], hp[li + 1]
            specs.append(pl.BlockSpec((kd, nd), lambda i: (0, 0), **extra))   # weight
            specs.append(pl.BlockSpec((1, nd), lambda i: (0, 0), **extra))    # bias
        return specs

    # ---- outputs (true widths only) ----
    want_kernel_emb = return_embeddings and n_hidden > 0
    real_emb_width = hidden_dims[-1] if n_hidden > 0 else F_in

    out_shapes = [jax.ShapeDtypeStruct((Bp, n_logits), jnp.float32)]
    out_specs = [pl.BlockSpec((TB, n_logits), lambda i: (i, 0))]
    if want_kernel_emb:
        out_shapes.append(jax.ShapeDtypeStruct((Bp, real_emb_width), jnp.float32))
        out_specs.append(pl.BlockSpec((TB, real_emb_width), lambda i: (i, 0)))

    kernel = _make_fused_mlp_kernel(n_hidden, real_emb_width if want_kernel_emb else None,
                                    compute_dtype)

    # ---- VMEM budget from the actual footprint (clamped inside v7x's 64 MiB physical) ----
    itemsize = jnp.dtype(compute_dtype).itemsize
    footprint = 2 * TB * F_in * itemsize                 # double-buffered x tile
    footprint += 2 * TB * n_logits * 4                   # double-buffered logits tile
    if want_kernel_emb:
        footprint += 2 * TB * real_emb_width * 4
    for li in range(len(layer_wb)):
        footprint += 2 * hp[li] * hp[li + 1] * itemsize  # weights (x2: conservative)
        footprint += 2 * hp[li + 1] * 4                  # biases
    widest = max(hp)
    footprint += 2 * TB * widest * (4 + itemsize)        # live activations inside the body
    vmem_limit = max(footprint + (4 << 20), 16 << 20)
    vmem_limit = int(min(vmem_limit, 60 << 20))

    compiler_params = pltpu.CompilerParams(
        dimension_semantics=("parallel",),               # batch axis -> megacore / 2nd TC
        vmem_limit_bytes=vmem_limit,
    )

    def _call(single_buffer_weights):
        return pl.pallas_call(
            kernel,
            grid=grid,
            in_specs=make_in_specs(single_buffer_weights),
            out_specs=tuple(out_specs) if want_kernel_emb else out_specs[0],
            out_shape=tuple(out_shapes) if want_kernel_emb else out_shapes[0],
            compiler_params=compiler_params,
        )(*flat_inputs)

    try:
        outs = _call(True)
    except Exception:
        # TODO(synk): pl.Buffered(1) rejected on this JAX build; fall back to default buffering.
        outs = _call(False)

    if want_kernel_emb:
        logits_p, emb_p = outs
        return logits_p[:B], emb_p[:B]
    logits = outs[:B]
    if return_embeddings:
        # n_hidden == 0: PyTorch returns the raw input as the embedding.
        return logits, tabular_data
    return logits


# ---------------- parameter init (torch.nn.Linear-like), weights stored (in, out) ----------------

def init_linear_params(key, in_features, out_features):
    kw, kb = jax.random.split(key)
    bound = 1.0 / jnp.sqrt(jnp.float32(in_features))
    w = jax.random.uniform(kw, (in_features, out_features), jnp.float32, -bound, bound)
    b = jax.random.uniform(kb, (out_features,), jnp.float32, -bound, bound)
    return w, b


def init_model_params(key, in_features, n_layers, out_features_list):
    params = {"linear_layers": [], "final_layer": None}
    f_in = in_features
    for i in range(n_layers):
        key, sub = jax.random.split(key)
        w, b = init_linear_params(sub, f_in, out_features_list[i])
        params["linear_layers"].append((w, b))
        f_in = out_features_list[i]
    key, sub = jax.random.split(key)
    params["final_layer"] = init_linear_params(sub, f_in, 2)
    return params


# ---------------- pure-JAX reference with matching bf16 MXU rounding ----------------

def reference_forward(params, tabular_data, compute_dtype=jnp.bfloat16):
    h = tabular_data.astype(compute_dtype)
    last_hidden = tabular_data
    for (w, b) in params["linear_layers"]:
        y = jnp.dot(h, w.astype(compute_dtype), preferred_element_type=jnp.float32) + b
        y = jnp.maximum(y, 0.0)
        last_hidden = y
        h = y.astype(compute_dtype)
    wf, bf = params["final_layer"]
    logits = jnp.dot(h, wf.astype(compute_dtype), preferred_element_type=jnp.float32) + bf
    return logits, last_hidden


if __name__ == "__main__":
    key = jax.random.PRNGKey(0)

    # Small, module-consistent shapes.
    batch = 8
    in_features = 16
    n_layers = 2
    out_features_list = [32, 16]
    seq_len = 8  # sequence_data is unused by forward(), kept for signature parity

    k_params, k_tab, k_seq = jax.random.split(key, 3)
    params = init_model_params(k_params, in_features, n_layers, out_features_list)

    tabular_data = jax.random.normal(k_tab, (batch, in_features), jnp.float32)
    sequence_data = jax.random.normal(k_seq, (batch, seq_len), jnp.float32)

    # Single fused-kernel forward (logits only).
    logits = linear_nn_forward(params, tabular_data, sequence_data)
    logits = jax.block_until_ready(logits)

    # return_embeddings path (matches PyTorch's (logits, x) tuple).
    logits2, emb = linear_nn_forward(params, tabular_data, sequence_data, return_embeddings=True)
    jax.block_until_ready((logits2, emb))

    ref_logits, ref_emb = reference_forward(params, tabular_data)
    assert logits.shape == (batch, 2), logits.shape
    assert emb.shape == (batch, out_features_list[-1]), emb.shape
    assert jnp.allclose(logits, ref_logits, atol=1e-2, rtol=1e-2), "logits mismatch vs reference"
    assert jnp.allclose(logits2, ref_logits, atol=1e-2, rtol=1e-2), "logits (emb path) mismatch"
    assert jnp.allclose(emb, ref_emb, atol=1e-2, rtol=1e-2), "embeddings mismatch vs reference"

    # Exercise a multi-step batch grid with padding (B not a multiple of 16) -> 2 grid steps.
    batch2 = 40
    k_tab2 = jax.random.PRNGKey(7)
    tab2 = jax.random.normal(k_tab2, (batch2, in_features), jnp.float32)
    logits_big = jax.block_until_ready(linear_nn_forward(params, tab2, None))
    ref_big, _ = reference_forward(params, tab2)
    assert logits_big.shape == (batch2, 2), logits_big.shape
    assert jnp.allclose(logits_big, ref_big, atol=1e-2, rtol=1e-2), "multi-step grid mismatch"

    print("KERNEL_OK")
</pallas_src>

<mosaic_0001>
module attributes {stable_mosaic.version = 11 : i64} {
  func.func @kernel(%arg0: i32, %arg1: memref<16x16xbf16, #tpu.memory_space<vmem>>, %arg2: memref<16x128xbf16, #tpu.memory_space<vmem>>, %arg3: memref<1x128xf32, #tpu.memory_space<vmem>>, %arg4: memref<128x128xbf16, #tpu.memory_space<vmem>>, %arg5: memref<1x128xf32, #tpu.memory_space<vmem>>, %arg6: memref<128x2xbf16, #tpu.memory_space<vmem>>, %arg7: memref<1x2xf32, #tpu.memory_space<vmem>>, %arg8: memref<16x2xf32, #tpu.memory_space<vmem>>) attributes {dimension_semantics = [#tpu.dimension_semantics<parallel>], iteration_bounds = array<i64: 1>, scalar_prefetch = 0 : i64, scratch_operands = 0 : i64, tpu.core_type = #tpu.core_type<tc>, window_params = [{transform_indices = @transform_0, window_bounds = array<i64: 16, 16>}, {pipeline_mode = #tpu.pipeline_mode<synchronous>, transform_indices = @transform_1, window_bounds = array<i64: 16, 128>}, {pipeline_mode = #tpu.pipeline_mode<synchronous>, transform_indices = @transform_2, window_bounds = array<i64: 1, 128>}, {pipeline_mode = #tpu.pipeline_mode<synchronous>, transform_indices = @transform_3, window_bounds = array<i64: 128, 128>}, {pipeline_mode = #tpu.pipeline_mode<synchronous>, transform_indices = @transform_4, window_bounds = array<i64: 1, 128>}, {pipeline_mode = #tpu.pipeline_mode<synchronous>, transform_indices = @transform_5, window_bounds = array<i64: 128, 2>}, {pipeline_mode = #tpu.pipeline_mode<synchronous>, transform_indices = @transform_6, window_bounds = array<i64: 1, 2>}, {transform_indices = @transform_7, window_bounds = array<i64: 16, 2>}]} {
    %c0 = arith.constant 0 : index
    %c0_0 = arith.constant 0 : index
    %0 = vector.load %arg1[%c0, %c0_0] : memref<16x16xbf16, #tpu.memory_space<vmem>>, vector<16x16xbf16>
    %c0_1 = arith.constant 0 : index
    %c0_2 = arith.constant 0 : index
    %1 = vector.load %arg2[%c0_1, %c0_2] : memref<16x128xbf16, #tpu.memory_space<vmem>>, vector<16x128xbf16>
    %c0_3 = arith.constant 0 : index
    %c0_4 = arith.constant 0 : index
    %2 = vector.load %arg3[%c0_3, %c0_4] : memref<1x128xf32, #tpu.memory_space<vmem>>, vector<1x128xf32>
    %cst = arith.constant dense<0.000000e+00> : vector<16x128xf32>
    %3 = tpu.matmul %0, %1, %cst {dimension_numbers = #tpu.dot_dimension_numbers<[1], [0], [0], [1], [0, 0, 1, 1], [], []>} : vector<16x16xbf16>, vector<16x128xbf16>, vector<16x128xf32> -> vector<16x128xf32>
    %4 = vector.broadcast %2 : vector<1x128xf32> to vector<16x128xf32>
    %5 = arith.addf %3, %4 : vector<16x128xf32>
    %cst_5 = arith.constant 0.000000e+00 : f32
    %6 = vector.broadcast %cst_5 : f32 to vector<16x128xf32>
    %7 = arith.maximumf %5, %6 : vector<16x128xf32>
    %8 = arith.truncf %7 : vector<16x128xf32> to vector<16x128xbf16>
    %c0_6 = arith.constant 0 : index
    %c0_7 = arith.constant 0 : index
    %9 = vector.load %arg4[%c0_6, %c0_7] : memref<128x128xbf16, #tpu.memory_space<vmem>>, vector<128x128xbf16>
    %c0_8 = arith.constant 0 : index
    %c0_9 = arith.constant 0 : index
    %10 = vector.load %arg5[%c0_8, %c0_9] : memref<1x128xf32, #tpu.memory_space<vmem>>, vector<1x128xf32>
    %cst_10 = arith.constant dense<0.000000e+00> : vector<16x128xf32>
    %11 = tpu.matmul %8, %9, %cst_10 {dimension_numbers = #tpu.dot_dimension_numbers<[1], [0], [0], [1], [0, 0, 1, 1], [], []>} : vector<16x128xbf16>, vector<128x128xbf16>, vector<16x128xf32> -> vector<16x128xf32>
    %12 = vector.broadcast %10 : vector<1x128xf32> to vector<16x128xf32>
    %13 = arith.addf %11, %12 : vector<16x128xf32>
    %cst_11 = arith.constant 0.000000e+00 : f32
    %14 = vector.broadcast %cst_11 : f32 to vector<16x128xf32>
    %15 = arith.maximumf %13, %14 : vector<16x128xf32>
    %16 = arith.truncf %15 : vector<16x128xf32> to vector<16x128xbf16>
    %c0_12 = arith.constant 0 : index
    %c0_13 = arith.constant 0 : index
    %17 = vector.load %arg6[%c0_12, %c0_13] : memref<128x2xbf16, #tpu.memory_space<vmem>>, vector<128x2xbf16>
    %c0_14 = arith.constant 0 : index
    %c0_15 = arith.constant 0 : index
    %18 = vector.load %arg7[%c0_14, %c0_15] : memref<1x2xf32, #tpu.memory_space<vmem>>, vector<1x2xf32>
    %cst_16 = arith.constant dense<0.000000e+00> : vector<16x2xf32>
    %19 = tpu.matmul %16, %17, %cst_16 {dimension_numbers = #tpu.dot_dimension_numbers<[1], [0], [0], [1], [0, 0, 1, 1], [], []>} : vector<16x128xbf16>, vector<128x2xbf16>, vector<16x2xf32> -> vector<16x2xf32>
    %20 = vector.broadcast %18 : vector<1x2xf32> to vector<16x2xf32>
    %21 = arith.addf %19, %20 : vector<16x2xf32>
    %c0_17 = arith.constant 0 : index
    %c0_18 = arith.constant 0 : index
    %22 = vector.load %arg8[%c0_17, %c0_18] : memref<16x2xf32, #tpu.memory_space<vmem>>, vector<16x2xf32>
    tpu.vector_store %arg8[%c0_17, %c0_18], %21 {strides = array<i32>} : memref<16x2xf32, #tpu.memory_space<vmem>>, vector<16x2xf32>,
    return
  }
  func.func @transform_0(%arg0: i32) -> (i32, i32) {
    %c0_i32 = arith.constant 0 : i32
    %c0_i32_0 = arith.constant 0 : i32
    return %arg0, %c0_i32 : i32, i32
  }
  func.func @transform_1(%arg0: i32) -> (i32, i32) {
    %c0_i32 = arith.constant 0 : i32
    %c0_i32_0 = arith.constant 0 : i32
    %c0_i32_1 = arith.constant 0 : i32
    return %c0_i32, %c0_i32_0 : i32, i32
  }
  func.func @transform_2(%arg0: i32) -> (i32, i32) {
    %c0_i32 = arith.constant 0 : i32
    %c0_i32_0 = arith.constant 0 : i32
    %c0_i32_1 = arith.constant 0 : i32
    return %c0_i32, %c0_i32_0 : i32, i32
  }
  func.func @transform_3(%arg0: i32) -> (i32, i32) {
    %c0_i32 = arith.constant 0 : i32
    %c0_i32_0 = arith.constant 0 : i32
    %c0_i32_1 = arith.constant 0 : i32
    return %c0_i32, %c0_i32_0 : i32, i32
  }
  func.func @transform_4(%arg0: i32) -> (i32, i32) {
    %c0_i32 = arith.constant 0 : i32
    %c0_i32_0 = arith.constant 0 : i32
    %c0_i32_1 = arith.constant 0 : i32
    return %c0_i32, %c0_i32_0 : i32, i32
  }
  func.func @transform_5(%arg0: i32) -> (i32, i32) {
    %c0_i32 = arith.constant 0 : i32
    %c0_i32_0 = arith.constant 0 : i32
    %c0_i32_1 = arith.constant 0 : i32
    return %c0_i32, %c0_i32_0 : i32, i32
  }
  func.func @transform_6(%arg0: i32) -> (i32, i32) {
    %c0_i32 = arith.constant 0 : i32
    %c0_i32_0 = arith.constant 0 : i32
    %c0_i32_1 = arith.constant 0 : i32
    return %c0_i32, %c0_i32_0 : i32, i32
  }
  func.func @transform_7(%arg0: i32) -> (i32, i32) {
    %c0_i32 = arith.constant 0 : i32
    %c0_i32_0 = arith.constant 0 : i32
    return %arg0, %c0_i32 : i32, i32
  }
}

module attributes {stable_mosaic.version = 11 : i64} {
  func.func @kernel(%arg0: i32, %arg1: memref<16x16xbf16, #tpu.memory_space<vmem>>, %arg2: memref<16x128xbf16, #tpu.memory_space<vmem>>, %arg3: memref<1x128xf32, #tpu.memory_space<vmem>>, %arg4: memref<128x128xbf16, #tpu.memory_space<vmem>>, %arg5: memref<1x128xf32, #tpu.memory_space<vmem>>, %arg6: memref<128x2xbf16, #tpu.memory_space<vmem>>, %arg7: memref<1x2xf32, #tpu.memory_space<vmem>>, %arg8: memref<16x2xf32, #tpu.memory_space<vmem>>) attributes {dimension_semantics = [#tpu.dimension_semantics<parallel>], iteration_bounds = array<i64: 1>, scalar_prefetch = 0 : i64, scratch_operands = 0 : i64, tpu.core_type = #tpu.core_type<tc>, window_params = [{transform_indices = @transform_0, window_bounds = array<i64: 16, 16>}, {pipeline_mode = #tpu.pipeline_mode<synchronous>, transform_indices = @transform_1, window_bounds = array<i64: 16, 128>}, {pipeline_mode = #tpu.pipeline_mode<synchronous>, transform_indices = @transform_2, window_bounds = array<i64: 1, 128>}, {pipeline_mode = #tpu.pipeline_mode<synchronous>, transform_indices = @transform_3, window_bounds = array<i64: 128, 128>}, {pipeline_mode = #tpu.pipeline_mode<synchronous>, transform_indices = @transform_4, window_bounds = array<i64: 1, 128>}, {pipeline_mode = #tpu.pipeline_mode<synchronous>, transform_indices = @transform_5, window_bounds = array<i64: 128, 2>}, {pipeline_mode = #tpu.pipeline_mode<synchronous>, transform_indices = @transform_6, window_bounds = array<i64: 1, 2>}, {transform_indices = @transform_7, window_bounds = array<i64: 16, 2>}]} {
    %c0 = arith.constant 0 : index
    %c0_0 = arith.constant 0 : index
    %0 = vector.load %arg1[%c0, %c0_0] : memref<16x16xbf16, #tpu.memory_space<vmem>>, vector<16x16xbf16>
    %c0_1 = arith.constant 0 : index
    %c0_2 = arith.constant 0 : index
    %1 = vector.load %arg2[%c0_1, %c0_2] : memref<16x128xbf16, #tpu.memory_space<vmem>>, vector<16x128xbf16>
    %c0_3 = arith.constant 0 : index
    %c0_4 = arith.constant 0 : index
    %2 = vector.load %arg3[%c0_3, %c0_4] : memref<1x128xf32, #tpu.memory_space<vmem>>, vector<1x128xf32>
    %cst = arith.constant dense<0.000000e+00> : vector<16x128xf32>
    %3 = tpu.matmul %0, %1, %cst {dimension_numbers = #tpu.dot_dimension_numbers<[1], [0], [0], [1], [0, 0, 1, 1], [], []>} : vector<16x16xbf16>, vector<16x128xbf16>, vector<16x128xf32> -> vector<16x128xf32>
    %4 = vector.broadcast %2 : vector<1x128xf32> to vector<16x128xf32>
    %5 = arith.addf %3, %4 : vector<16x128xf32>
    %cst_5 = arith.constant 0.000000e+00 : f32
    %6 = vector.broadcast %cst_5 : f32 to vector<16x128xf32>
    %7 = arith.maximumf %5, %6 : vector<16x128xf32>
    %8 = arith.truncf %7 : vector<16x128xf32> to vector<16x128xbf16>
    %c0_6 = arith.constant 0 : index
    %c0_7 = arith.constant 0 : index
    %9 = vector.load %arg4[%c0_6, %c0_7] : memref<128x128xbf16, #tpu.memory_space<vmem>>, vector<128x128xbf16>
    %c0_8 = arith.constant 0 : index
    %c0_9 = arith.constant 0 : index
    %10 = vector.load %arg5[%c0_8, %c0_9] : memref<1x128xf32, #tpu.memory_space<vmem>>, vector<1x128xf32>
    %cst_10 = arith.constant dense<0.000000e+00> : vector<16x128xf32>
    %11 = tpu.matmul %8, %9, %cst_10 {dimension_numbers = #tpu.dot_dimension_numbers<[1], [0], [0], [1], [0, 0, 1, 1], [], []>} : vector<16x128xbf16>, vector<128x128xbf16>, vector<16x128xf32> -> vector<16x128xf32>
    %12 = vector.broadcast %10 : vector<1x128xf32> to vector<16x128xf32>
    %13 = arith.addf %11, %12 : vector<16x128xf32>
    %cst_11 = arith.constant 0.000000e+00 : f32
    %14 = vector.broadcast %cst_11 : f32 to vector<16x128xf32>
    %15 = arith.maximumf %13, %14 : vector<16x128xf32>
    %16 = arith.truncf %15 : vector<16x128xf32> to vector<16x128xbf16>
    %c0_12 = arith.constant 0 : index
    %c0_13 = arith.constant 0 : index
    %17 = vector.load %arg6[%c0_12, %c0_13] : memref<128x2xbf16, #tpu.memory_space<vmem>>, vector<128x2xbf16>
    %c0_14 = arith.constant 0 : index
    %c0_15 = arith.constant 0 : index
    %18 = vector.load %arg7[%c0_14, %c0_15] : memref<1x2xf32, #tpu.memory_space<vmem>>, vector<1x2xf32>
    %cst_16 = arith.constant dense<0.000000e+00> : vector<16x2xf32>
    %19 = tpu.matmul %16, %17, %cst_16 {dimension_numbers = #tpu.dot_dimension_numbers<[1], [0], [0], [1], [0, 0, 1, 1], [], []>} : vector<16x128xbf16>, vector<128x2xbf16>, vector<16x2xf32> -> vector<16x2xf32>
    %20 = vector.broadcast %18 : vector<1x2xf32> to vector<16x2xf32>
    %21 = arith.addf %19, %20 : vector<16x2xf32>
    %c0_17 = arith.constant 0 : index
    %c0_18 = arith.constant 0 : index
    %22 = vector.load %arg8[%c0_17, %c0_18] : memref<16x2xf32, #tpu.memory_space<vmem>>, vector<16x2xf32>
    tpu.vector_store %arg8[%c0_17, %c0_18], %21 {strides = array<i32>} : memref<16x2xf32, #tpu.memory_space<vmem>>, vector<16x2xf32>,
    return
  }
  func.func @transform_0(%arg0: i32) -> (i32, i32) {
    %c0_i32 = arith.constant 0 : i32
    %c0_i32_0 = arith.constant 0 : i32
    return %arg0, %c0_i32 : i32, i32
  }
  func.func @transform_1(%arg0: i32) -> (i32, i32) {
    %c0_i32 = arith.constant 0 : i32
    %c0_i32_0 = arith.constant 0 : i32
    %c0_i32_1 = arith.constant 0 : i32
    return %c0_i32, %c0_i32_0 : i32, i32
  }
  func.func @transform_2(%arg0: i32) -> (i32, i32) {
    %c0_i32 = arith.constant 0 : i32
    %c0_i32_0 = arith.constant 0 : i32
    %c0_i32_1 = arith.constant 0 : i32
    return %c0_i32, %c0_i32_0 : i32, i32
  }
  func.func @transform_3(%arg0: i32) -> (i32, i32) {
    %c0_i32 = arith.constant 0 : i32
    %c0_i32_0 = arith.constant 0 : i32
    %c0_i32_1 = arith.constant 0 : i32
    return %c0_i32, %c0_i32_0 : i32, i32
  }
  func.func @transform_4(%arg0: i32) -> (i32, i32) {
    %c0_i32 = arith.constant 0 : i32
    %c0_i32_0 = arith.constant 0 : i32
    %c0_i32_1 = arith.constant 0 : i32
    return %c0_i32, %c0_i32_0 : i32, i32
  }
  func.func @transform_5(%arg0: i32) -> (i32, i32) {
    %c0_i32 = arith.constant 0 : i32
    %c0_i32_0 = arith.constant 0 : i32
    %c0_i32_1 = arith.constant 0 : i32
    return %c0_i32, %c0_i32_0 : i32, i32
  }
  func.func @transform_6(%arg0: i32) -> (i32, i32) {
    %c0_i32 = arith.constant 0 : i32
    %c0_i32_0 = arith.constant 0 : i32
    %c0_i32_1 = arith.constant 0 : i32
    return %c0_i32, %c0_i32_0 : i32, i32
  }
  func.func @transform_7(%arg0: i32) -> (i32, i32) {
    %c0_i32 = arith.constant 0 : i32
    %c0_i32_0 = arith.constant 0 : i32
    return %arg0, %c0_i32 : i32, i32
  }
}

</mosaic_0001>

<bundles_post_ra>
// kernel: tpu_custom_call.1
= control target key start
LH: loop header
LB: loop body
LE: loop exit
PB: predicated region body
PF: predicated region fallthrough
CT: control target
= control target key end

     0   :  { %12 = vsyncpa [#allocation3], 0  ;;  %s481_s24 = smov [#allocation2]   ;;  %s624_s0 = inlined_call_operand.vmem [shape: bf16[16,16], index: 0, kind: input, shape index: {}]   ;;  %s625_s1 = inlined_call_operand.hbm [shape: bf16[16,128], index: 1, kind: input, shape index: {}]   ;;  %s626_s2 = inlined_call_operand.vmem [shape: f32[1,128], index: 2, kind: input, shape index: {}]   ;;  %s627_s3 = inlined_call_operand.vmem [shape: bf16[128,128], index: 3, kind: input, shape index: {}]   ;;  %s628_s4 = inlined_call_operand.vmem [shape: f32[1,128], index: 4, kind: input, shape index: {}]   ;;  %s629_s5 = inlined_call_operand.vmem [shape: bf16[128,2], index: 5, kind: input, shape index: {}]   ;;  %s630_s6 = inlined_call_operand.vmem [shape: f32[1,2], index: 6, kind: input, shape index: {}]   ;;  %s631_s7 = inlined_call_operand.vmem [shape: f32[16,2], index: 7, kind: output, shape index: {}]  }
   0x1   :  { %s20_s25 = sshll.u32 %s481_s24, 4  ;;  %s457_s28 = scalar_lea.hbm %s625_s1, 128  ;;  %s21_s25 = int_to_ptr.vmem [resolvable:$true] %s20_s25 }
   0x2   :  { %p458_p0 = scmp.ne.s32.totalorder %s625_s1, %s457_s28  ;;  %p461_p1 = scmp.lt.u32.totalorder %s457_s28, %s625_s1 }
   0x4   :  { %p463_p2 = pnand %p461_p1, %p458_p0 }
   0x6   :  { %466 = shalt.err (!%p463_p2)
}
   0x7   :  { %s467_s10 = scalar_lea.vmem %s21_s25, 128  ;;  %p472_p4 = scmp.lt.s32.totalorder %s21_s25, %s21_s25 }
   0x8   :  { %p468_p3 = scmp.ne.s32.totalorder %s21_s25, %s467_s10  ;;  %p473_p5 = scmp.lt.s32.totalorder %s467_s10, %s467_s10 }
   0xa   :  { %p474_p6 = por %p473_p5, %p472_p4 }
   0xc   :  { %p475_p7 = pnand %p474_p6, %p468_p3 }
   0xe   :  { %478 = shalt.err (!%p475_p7)
}
   0xf   :  { %s482_s11 = smov 64   ;;  %s483_s12 = smov 4  }
  0x10   :  { %26 = dma.hbm_to_vmem [thread:$0]  %s625_s1, 128, %s21_s25, [#allocation3], %s482_s11, %s482_s11, %s483_s12  }
  0x11   :  { %479 = dma.done.wait [#allocation3], 128  }
  0x12   :  { %480 = vsyncadd [#allocation3], 4294967168  ;;  %v484_v0 = vmov 0.0   ;;  %vm485_vm0 = vmmov 0   ;;  %v439_v1 = vld [vmem:[#allocation2] sm:$0xff]   ;;  %vm63_vm1 = vcmask 130048  }
  0x13   :  { %388 = vmatprep.subr.bf16.mxu0 %v484_v0  ;;  %390 = vmatprep.mubr.msk.bf16.mxu0 %vm485_vm0, %v484_v0  ;;  %v440_v2 = vld [vmem:[%s624_s0] sm:$0xff]   ;;  %v442_v4 = vld [vmem:[%s627_s3 + $0x8] sm:$0xff]   ;;  %v443_v5 = vld [vmem:[%s627_s3 + $0x10] sm:$0xff]   ;;  %vm338_vm2 = vcmask 15360  }
  0x14   :  { %394 = vmatprep.subr.bf16.mxu1 %v484_v0  ;;  %410 = vmatprep.mubr.msk.bf16.mxu1 %vm485_vm0, %v484_v0  ;;  %v441_v3 = vld [vmem:[%s627_s3] sm:$0xff]   ;;  %v444_v6 = vld [vmem:[%s627_s3 + $0x18] sm:$0xff]   ;;  %v446_v8 = vld [vmem:[%s627_s3 + $0x28] sm:$0xff]  }
  0x15   :  { %389 = vmatpush3.bf16.msra.mxu0 %v439_v1  ;;  %395 = vmatpush3.bf16.msra.mxu1 %v441_v3  ;;  %v445_v7 = vld [vmem:[%s627_s3 + $0x20] sm:$0xff]   ;;  %v447_v9 = vld [vmem:[%s627_s3 + $0x30] sm:$0xff]   ;;  %v448_v10 = vld [vmem:[%s627_s3 + $0x38] sm:$0xff]  }
  0x16   :  { %414 = vmatprep.subr.bf16.mxu0 %v484_v0  ;;  %396 = vmatprep.subr.bf16.mxu1 %v484_v0  ;;  %v449_v11 = vld [vmem:[%s629_s5] sm:$0xff]   ;;  %v450_v12 = vld [vmem:[%s629_s5 + $0x8] sm:$0xff]   ;;  %v451_v13 = vld [vmem:[%s629_s5 + $0x10] sm:$0xff]  }
  0x17   :  { %v452_v14 = vld [vmem:[%s629_s5 + $0x18] sm:$0xff]   ;;  %v453_v15 = vld [vmem:[%s629_s5 + $0x20] sm:$0xff]   ;;  %v454_v16 = vld [vmem:[%s629_s5 + $0x28] sm:$0xff]  }
  0x18   :  { %391 = vmatmul.mubr.msk.bf16.vlgmr.msra.gmra.mrb[0].mxu0 %vm63_vm1, %v440_v2  ;;  %v346_v17 = vld [vmem:[%s626_s2] ss:$0 sm:$0xff]  ;;  %v455_v27 = vld [vmem:[%s629_s5 + $0x30] sm:$0xff]   ;;  %v456_v28 = vld [vmem:[%s629_s5 + $0x38] sm:$0xff]  }
  0x19   :  { %430 = vmatprep.mubr.msk.bf16.mxu0 %vm485_vm0, %v484_v0  ;;  %397 = vmatpush3.bf16.msra.mxu1 %v442_v4  ;;  %v350_v29 = vld [vmem:[%s628_s4] ss:$0 sm:$0xff] }
  0x1a   :  { %398 = vmatprep.subr.bf16.mxu1 %v484_v0  ;;  %415 = vmatpush3.bf16.msra.mxu0 %v449_v11  ;;  %v359_v39 = vld [vmem:[%s630_s6] ss:$0 sm:$0xff] }
  0x1b   :  { %416 = vmatprep.subr.bf16.mxu0 %v484_v0 }
  0x1d   :  { %399 = vmatpush3.bf16.msra.mxu1 %v443_v5 }
  0x1e   :  { %400 = vmatprep.subr.bf16.mxu1 %v484_v0  ;;  %417 = vmatpush3.bf16.msra.mxu0 %v450_v12 }
  0x1f   :  { %418 = vmatprep.subr.bf16.mxu0 %v484_v0 }
  0x21   :  { %401 = vmatpush3.bf16.msra.mxu1 %v444_v6 }
  0x22   :  { %402 = vmatprep.subr.bf16.mxu1 %v484_v0  ;;  %419 = vmatpush3.bf16.msra.mxu0 %v451_v13 }
  0x23   :  { %420 = vmatprep.subr.bf16.mxu0 %v484_v0 }
  0x25   :  { %403 = vmatpush3.bf16.msra.mxu1 %v445_v7 }
  0x26   :  { %404 = vmatprep.subr.bf16.mxu1 %v484_v0  ;;  %421 = vmatpush3.bf16.msra.mxu0 %v452_v14 }
  0x27   :  { %422 = vmatprep.subr.bf16.mxu0 %v484_v0 }
  0x29   :  { %405 = vmatpush3.bf16.msra.mxu1 %v446_v8 }
  0x2a   :  { %406 = vmatprep.subr.bf16.mxu1 %v484_v0  ;;  %423 = vmatpush3.bf16.msra.mxu0 %v453_v15 }
  0x2b   :  { %424 = vmatprep.subr.bf16.mxu0 %v484_v0 }
  0x2d   :  { %407 = vmatpush3.bf16.msra.mxu1 %v447_v9 }
  0x2e   :  { %408 = vmatprep.subr.bf16.mxu1 %v484_v0  ;;  %425 = vmatpush3.bf16.msra.mxu0 %v454_v16 }
  0x2f   :  { %426 = vmatprep.subr.bf16.mxu0 %v484_v0 }
  0x31   :  { %409 = vmatpush3.bf16.msra.mxu1 %v448_v10 }
  0x32   :  { %427 = vmatpush3.bf16.msra.mxu0 %v455_v27 }
  0x33   :  { %428 = vmatprep.subr.bf16.mxu0 %v484_v0 }
  0x36   :  { %429 = vmatpush3.bf16.msra.mxu0 %v456_v28 }
  0xeb   :  { %v101_v18 = vpop.f32.mrb[0].mxu0 }
  0xec   :  { %v102_v19 = vadd.f32 %v346_v17, %v101_v18  ;;  %v392_v20 = vpop.f32.mrb[1].mxu0 }
  0xed   :  { %v104_v21 = vpop.f32.mrb[2].mxu0 }
  0xee   :  { %v105_v22 = vadd.f32 %v346_v17, %v104_v21  ;;  %v393_v23 = vpop.f32.mrb[3].mxu0  ;;  %v108_v24 = vmax.f32 %v102_v19, 0.0 }
  0xf0   :  { %v109_v25 = vmax.f32 %v105_v22, 0.0 }
  0xf2   :  { %v110_v26 = vpack.c.bf16 %v109_v25, %v108_v24 }
  0xf4   :  { %411 = vmatmul.mubr.bf16.vlgmr.msra.gmra.mrb[0].mxu1 %v110_v26 }
 0x1c7   :  { %v216_v30 = vpop.f32.mrb[0].mxu1 }
 0x1c8   :  { %v217_v31 = vadd.f32 %v350_v29, %v216_v30  ;;  %v412_v32 = vpop.f32.mrb[1].mxu1 }
 0x1c9   :  { %v219_v33 = vpop.f32.mrb[2].mxu1 }
 0x1ca   :  { %v220_v34 = vadd.f32 %v350_v29, %v219_v33  ;;  %v413_v35 = vpop.f32.mrb[3].mxu1  ;;  %v223_v36 = vmax.f32 %v217_v31, 0.0 }
 0x1cc   :  { %v224_v37 = vmax.f32 %v220_v34, 0.0 }
 0x1ce   :  { %v225_v38 = vpack.c.bf16 %v224_v37, %v223_v36 }
 0x1d0   :  { %431 = vmatmul.mubr.bf16.vlgmr.msra.gmra.mrb[4].mxu0 %v225_v38 }
 0x2a3   :  { %v331_v40 = vpop.f32.mrb[4].mxu0 }
 0x2a4   :  { %v332_v41 = vadd.f32 %v359_v39, %v331_v40  ;;  %v432_v42 = vpop.f32.mrb[5].mxu0 }
 0x2a5   :  { %v334_v43 = vpop.f32.mrb[6].mxu0 }
 0x2a6   :  { %339 = vst.msk [vmem:[%s631_s7] sm:$0xff] %vm338_vm2, %v332_v41  ;;  %v335_v44 = vadd.f32 %v359_v39, %v334_v43  ;;  %v433_v45 = vpop.f32.mrb[7].mxu0 }
 0x2a8   :  { %340 = vst.msk [vmem:[%s631_s7 + $0x8] sm:$0xff] %vm338_vm2, %v335_v44 }
 0x2a9   :  { %345 = vsyncpa [#allocation3], 1 }

// kernel: tpu_custom_call.1
= control target key start
LH: loop header
LB: loop body
LE: loop exit
PB: predicated region body
PF: predicated region fallthrough
CT: control target
= control target key end

     0   :  { %12 = vsyncpa [#allocation3], 0  ;;  %s481_s24 = smov [#allocation2]   ;;  %s624_s0 = inlined_call_operand.vmem [shape: bf16[16,16], index: 0, kind: input, shape index: {}]   ;;  %s625_s1 = inlined_call_operand.hbm [shape: bf16[16,128], index: 1, kind: input, shape index: {}]   ;;  %s626_s2 = inlined_call_operand.vmem [shape: f32[1,128], index: 2, kind: input, shape index: {}]   ;;  %s627_s3 = inlined_call_operand.vmem [shape: bf16[128,128], index: 3, kind: input, shape index: {}]   ;;  %s628_s4 = inlined_call_operand.vmem [shape: f32[1,128], index: 4, kind: input, shape index: {}]   ;;  %s629_s5 = inlined_call_operand.vmem [shape: bf16[128,2], index: 5, kind: input, shape index: {}]   ;;  %s630_s6 = inlined_call_operand.vmem [shape: f32[1,2], index: 6, kind: input, shape index: {}]   ;;  %s631_s7 = inlined_call_operand.vmem [shape: f32[16,2], index: 7, kind: output, shape index: {}]  }
   0x1   :  { %s20_s25 = sshll.u32 %s481_s24, 4  ;;  %s457_s28 = scalar_lea.hbm %s625_s1, 128  ;;  %s21_s25 = int_to_ptr.vmem [resolvable:$true] %s20_s25 }
   0x2   :  { %p458_p0 = scmp.ne.s32.totalorder %s625_s1, %s457_s28  ;;  %p461_p1 = scmp.lt.u32.totalorder %s457_s28, %s625_s1 }
   0x4   :  { %p463_p2 = pnand %p461_p1, %p458_p0 }
   0x6   :  { %466 = shalt.err (!%p463_p2)
}
   0x7   :  { %s467_s10 = scalar_lea.vmem %s21_s25, 128  ;;  %p472_p4 = scmp.lt.s32.totalorder %s21_s25, %s21_s25 }
   0x8   :  { %p468_p3 = scmp.ne.s32.totalorder %s21_s25, %s467_s10  ;;  %p473_p5 = scmp.lt.s32.totalorder %s467_s10, %s467_s10 }
   0xa   :  { %p474_p6 = por %p473_p5, %p472_p4 }
   0xc   :  { %p475_p7 = pnand %p474_p6, %p468_p3 }
   0xe   :  { %478 = shalt.err (!%p475_p7)
}
   0xf   :  { %s482_s11 = smov 64   ;;  %s483_s12 = smov 4  }
  0x10   :  { %26 = dma.hbm_to_vmem [thread:$0]  %s625_s1, 128, %s21_s25, [#allocation3], %s482_s11, %s482_s11, %s483_s12  }
  0x11   :  { %479 = dma.done.wait [#allocation3], 128  }
  0x12   :  { %480 = vsyncadd [#allocation3], 4294967168  ;;  %v484_v0 = vmov 0.0   ;;  %vm485_vm0 = vmmov 0   ;;  %v439_v1 = vld [vmem:[#allocation2] sm:$0xff]   ;;  %vm63_vm1 = vcmask 130048  }
  0x13   :  { %388 = vmatprep.subr.bf16.mxu0 %v484_v0  ;;  %390 = vmatprep.mubr.msk.bf16.mxu0 %vm485_vm0, %v484_v0  ;;  %v440_v2 = vld [vmem:[%s624_s0] sm:$0xff]   ;;  %v442_v4 = vld [vmem:[%s627_s3 + $0x8] sm:$0xff]   ;;  %v443_v5 = vld [vmem:[%s627_s3 + $0x10] sm:$0xff]   ;;  %vm338_vm2 = vcmask 15360  }
  0x14   :  { %394 = vmatprep.subr.bf16.mxu1 %v484_v0  ;;  %410 = vmatprep.mubr.msk.bf16.mxu1 %vm485_vm0, %v484_v0  ;;  %v441_v3 = vld [vmem:[%s627_s3] sm:$0xff]   ;;  %v444_v6 = vld [vmem:[%s627_s3 + $0x18] sm:$0xff]   ;;  %v446_v8 = vld [vmem:[%s627_s3 + $0x28] sm:$0xff]  }
  0x15   :  { %389 = vmatpush3.bf16.msra.mxu0 %v439_v1  ;;  %395 = vmatpush3.bf16.msra.mxu1 %v441_v3  ;;  %v445_v7 = vld [vmem:[%s627_s3 + $0x20] sm:$0xff]   ;;  %v447_v9 = vld [vmem:[%s627_s3 + $0x30] sm:$0xff]   ;;  %v448_v10 = vld [vmem:[%s627_s3 + $0x38] sm:$0xff]  }
  0x16   :  { %414 = vmatprep.subr.bf16.mxu0 %v484_v0  ;;  %396 = vmatprep.subr.bf16.mxu1 %v484_v0  ;;  %v449_v11 = vld [vmem:[%s629_s5] sm:$0xff]   ;;  %v450_v12 = vld [vmem:[%s629_s5 + $0x8] sm:$0xff]   ;;  %v451_v13 = vld [vmem:[%s629_s5 + $0x10] sm:$0xff]  }
  0x17   :  { %v452_v14 = vld [vmem:[%s629_s5 + $0x18] sm:$0xff]   ;;  %v453_v15 = vld [vmem:[%s629_s5 + $0x20] sm:$0xff]   ;;  %v454_v16 = vld [vmem:[%s629_s5 + $0x28] sm:$0xff]  }
  0x18   :  { %391 = vmatmul.mubr.msk.bf16.vlgmr.msra.gmra.mrb[0].mxu0 %vm63_vm1, %v440_v2  ;;  %v346_v17 = vld [vmem:[%s626_s2] ss:$0 sm:$0xff]  ;;  %v455_v27 = vld [vmem:[%s629_s5 + $0x30] sm:$0xff]   ;;  %v456_v28 = vld [vmem:[%s629_s5 + $0x38] sm:$0xff]  }
  0x19   :  { %430 = vmatprep.mubr.msk.bf16.mxu0 %vm485_vm0, %v484_v0  ;;  %397 = vmatpush3.bf16.msra.mxu1 %v442_v4  ;;  %v350_v29 = vld [vmem:[%s628_s4] ss:$0 sm:$0xff] }
  0x1a   :  { %398 = vmatprep.subr.bf16.mxu1 %v484_v0  ;;  %415 = vmatpush3.bf16.msra.mxu0 %v449_v11  ;;  %v359_v39 = vld [vmem:[%s630_s6] ss:$0 sm:$0xff] }
  0x1b   :  { %416 = vmatprep.subr.bf16.mxu0 %v484_v0 }
  0x1d   :  { %399 = vmatpush3.bf16.msra.mxu1 %v443_v5 }
  0x1e   :  { %400 = vmatprep.subr.bf16.mxu1 %v484_v0  ;;  %417 = vmatpush3.bf16.msra.mxu0 %v450_v12 }
  0x1f   :  { %418 = vmatprep.subr.bf16.mxu0 %v484_v0 }
  0x21   :  { %401 = vmatpush3.bf16.msra.mxu1 %v444_v6 }
  0x22   :  { %402 = vmatprep.subr.bf16.mxu1 %v484_v0  ;;  %419 = vmatpush3.bf16.msra.mxu0 %v451_v13 }
  0x23   :  { %420 = vmatprep.subr.bf16.mxu0 %v484_v0 }
  0x25   :  { %403 = vmatpush3.bf16.msra.mxu1 %v445_v7 }
  0x26   :  { %404 = vmatprep.subr.bf16.mxu1 %v484_v0  ;;  %421 = vmatpush3.bf16.msra.mxu0 %v452_v14 }
  0x27   :  { %422 = vmatprep.subr.bf16.mxu0 %v484_v0 }
  0x29   :  { %405 = vmatpush3.bf16.msra.mxu1 %v446_v8 }
  0x2a   :  { %406 = vmatprep.subr.bf16.mxu1 %v484_v0  ;;  %423 = vmatpush3.bf16.msra.mxu0 %v453_v15 }
  0x2b   :  { %424 = vmatprep.subr.bf16.mxu0 %v484_v0 }
  0x2d   :  { %407 = vmatpush3.bf16.msra.mxu1 %v447_v9 }
  0x2e   :  { %408 = vmatprep.subr.bf16.mxu1 %v484_v0  ;;  %425 = vmatpush3.bf16.msra.mxu0 %v454_v16 }
  0x2f   :  { %426 = vmatprep.subr.bf16.mxu0 %v484_v0 }
  0x31   :  { %409 = vmatpush3.bf16.msra.mxu1 %v448_v10 }
  0x32   :  { %427 = vmatpush3.bf16.msra.mxu0 %v455_v27 }
  0x33   :  { %428 = vmatprep.subr.bf16.mxu0 %v484_v0 }
  0x36   :  { %429 = vmatpush3.bf16.msra.mxu0 %v456_v28 }
  0xeb   :  { %v101_v18 = vpop.f32.mrb[0].mxu0 }
  0xec   :  { %v102_v19 = vadd.f32 %v346_v17, %v101_v18  ;;  %v392_v20 = vpop.f32.mrb[1].mxu0 }
  0xed   :  { %v104_v21 = vpop.f32.mrb[2].mxu0 }
  0xee   :  { %v105_v22 = vadd.f32 %v346_v17, %v104_v21  ;;  %v393_v23 = vpop.f32.mrb[3].mxu0  ;;  %v108_v24 = vmax.f32 %v102_v19, 0.0 }
  0xf0   :  { %v109_v25 = vmax.f32 %v105_v22, 0.0 }
  0xf2   :  { %v110_v26 = vpack.c.bf16 %v109_v25, %v108_v24 }
  0xf4   :  { %411 = vmatmul.mubr.bf16.vlgmr.msra.gmra.mrb[0].mxu1 %v110_v26 }
 0x1c7   :  { %v216_v30 = vpop.f32.mrb[0].mxu1 }
 0x1c8   :  { %v217_v31 = vadd.f32 %v350_v29, %v216_v30  ;;  %v412_v32 = vpop.f32.mrb[1].mxu1 }
 0x1c9   :  { %v219_v33 = vpop.f32.mrb[2].mxu1 }
 0x1ca   :  { %v220_v34 = vadd.f32 %v350_v29, %v219_v33  ;;  %v413_v35 = vpop.f32.mrb[3].mxu1  ;;  %v223_v36 = vmax.f32 %v217_v31, 0.0 }
 0x1cc   :  { %v224_v37 = vmax.f32 %v220_v34, 0.0 }
 0x1ce   :  { %v225_v38 = vpack.c.bf16 %v224_v37, %v223_v36 }
 0x1d0   :  { %431 = vmatmul.mubr.bf16.vlgmr.msra.gmra.mrb[4].mxu0 %v225_v38 }
 0x2a3   :  { %v331_v40 = vpop.f32.mrb[4].mxu0 }
 0x2a4   :  { %v332_v41 = vadd.f32 %v359_v39, %v331_v40  ;;  %v432_v42 = vpop.f32.mrb[5].mxu0 }
 0x2a5   :  { %v334_v43 = vpop.f32.mrb[6].mxu0 }
 0x2a6   :  { %339 = vst.msk [vmem:[%s631_s7] sm:$0xff] %vm338_vm2, %v332_v41  ;;  %v335_v44 = vadd.f32 %v359_v39, %v334_v43  ;;  %v433_v45 = vpop.f32.mrb[7].mxu0 }
 0x2a8   :  { %340 = vst.msk [vmem:[%s631_s7 + $0x8] sm:$0xff] %vm338_vm2, %v335_v44 }
 0x2a9   :  { %345 = vsyncpa [#allocation3], 1 }

</bundles_post_ra>
